<compile_context>
chip_gen: v5e
topology: v5e:2x2
jax: 0.10.0
libtpu: 0.0.40
codegen_flags: <defaults>
</compile_context>

<pallas_src>
import jax
import jax.numpy as jnp
from jax.experimental import pallas as pl
from jax.experimental.pallas import tpu as pltpu


def _round_up(x, n):
    return ((x + n - 1) // n) * n


def _case_activation_kernel(x_ref, w_ref, b_ref, o_ref, acc_ref):
    k = pl.program_id(2)

    @pl.when(k == 0)
    def _():
        acc_ref[...] = jnp.zeros_like(acc_ref)

    # leaky_relu (negative_slope=0.01) on the (F, C)-transposed weight tile.
    # NOTE: re-applied whenever this W tile is revisited across M tiles; it is
    # VALU filler that hides under MXU slack for these shapes.
    w = w_ref[...]
    w_lr = jnp.where(w >= 0, w, 0.01 * w)

    # Native MXU path: (tm, tf) @ (tf, tc) -> f32 accumulator.
    acc_ref[...] += jnp.dot(x_ref[...], w_lr, preferred_element_type=jnp.float32)

    @pl.when(k == pl.num_programs(2) - 1)
    def _():
        # sigmoid(bias - s) = 1 / (1 + exp(s - bias)).
        # Clamp the exponent so exp never hits inf (sigmoid is ~0 there anyway).
        e = jnp.exp(jnp.minimum(acc_ref[...] - b_ref[...], 30.0))
        o_ref[...] = pl.reciprocal(1.0 + e, approx=True).astype(o_ref.dtype)


def case_activation_layer(x, fa_weight, bias):
    """x: (m, 1, F) f32; fa_weight: (num_cases, F); bias: (num_cases,)."""
    # TODO(synk): weight_sharing=True path (1-D shared fa_weight) not implemented here.
    m = x.shape[0]
    num_cases, num_features = fa_weight.shape

    x2d = x.reshape(m, num_features)
    wT = fa_weight.T                      # one-time layout change: (F, C)
    b2d = bias.reshape(1, num_cases)

    # ---- tile sizing / padding -------------------------------------------
    # M: sublane multiple of 8, tiled at 256 when large.
    if m <= 256:
        tm = M_pad = _round_up(m, 8)
    else:
        tm = 256
        M_pad = _round_up(m, tm)
    # C: lane multiple of 128 (lane-dense stores), tiled at 256 when large.
    C_pad = _round_up(num_cases, 128)
    if C_pad <= 256:
        tc = C_pad
    else:
        tc = 256
        C_pad = _round_up(num_cases, tc)
    # F (reduction): single full block when small, else 512-wide tiles.
    if num_features <= 512:
        tf = F_pad = num_features
    else:
        tf = 512
        F_pad = _round_up(num_features, tf)

    if (M_pad, F_pad) != (m, num_features):
        x2d = jnp.pad(x2d, ((0, M_pad - m), (0, F_pad - num_features)))
    if (F_pad, C_pad) != (num_features, num_cases):
        wT = jnp.pad(wT, ((0, F_pad - num_features), (0, C_pad - num_cases)))
    if C_pad != num_cases:
        b2d = jnp.pad(b2d, ((0, 0), (0, C_pad - num_cases)))

    grid = (M_pad // tm, C_pad // tc, F_pad // tf)

    # Explicit VMEM budget (double-buffered ins + out, plus accumulator),
    # with headroom; kept well under v7x's 64 MiB physical VMEM.
    vmem_bytes = 4 * (2 * (tm * tf + tf * tc + tc) + 3 * tm * tc)
    vmem_limit = int(min(max(2 * vmem_bytes, 4 << 20), 64 << 20))

    out = pl.pallas_call(
        _case_activation_kernel,
        out_shape=jax.ShapeDtypeStruct((M_pad, C_pad), x.dtype),
        grid_spec=pltpu.PrefetchScalarGridSpec(
            num_scalar_prefetch=0,
            grid=grid,
            in_specs=[
                pl.BlockSpec((tm, tf), lambda i, j, k: (i, k)),   # x tile
                pl.BlockSpec((tf, tc), lambda i, j, k: (k, j)),   # W^T tile
                pl.BlockSpec((1, tc), lambda i, j, k: (0, j)),    # bias tile
            ],
            out_specs=pl.BlockSpec((tm, tc), lambda i, j, k: (i, j)),
            scratch_shapes=[pltpu.VMEM((tm, tc), jnp.float32)],
        ),
        compiler_params=pltpu.CompilerParams(
            dimension_semantics=("parallel", "parallel", "arbitrary"),
            vmem_limit_bytes=vmem_limit,
        ),
    )(x2d, wT, b2d)

    return out[:m, :num_cases]


def _reference(x, fa_weight, bias):
    w_lr = jnp.where(fa_weight >= 0, fa_weight, 0.01 * fa_weight)
    z = -jnp.sum(x * w_lr[None, :, :], axis=2) + bias[None, :]
    return jax.nn.sigmoid(z)


if __name__ == "__main__":
    key = jax.random.PRNGKey(0)

    # --- module hyperparameters (small, matching the forward pass) ----------
    m, num_features, num_cases, discount = 8, 32, 16, 4.0
    fa_weight = jnp.ones((num_cases, num_features), jnp.float32)
    bias = jnp.ones((num_cases,), jnp.float32) * num_features / discount

    k0, k1, k2 = jax.random.split(key, 3)
    x = jax.random.normal(k0, (m, 1, num_features), dtype=jnp.float32)

    out = jax.block_until_ready(case_activation_layer(x, fa_weight, bias))
    ref = _reference(x, fa_weight, bias)
    assert out.shape == (m, num_cases)
    assert jnp.allclose(out, ref, atol=5e-3, rtol=5e-3)

    # --- a second, slightly larger case that exercises the tiled F-reduction ---
    m2, f2, c2 = 40, 700, 200
    w2 = 0.1 * jax.random.normal(k1, (c2, f2), dtype=jnp.float32)
    b2 = jnp.ones((c2,), jnp.float32) * f2 / discount
    x2 = jax.random.normal(k2, (m2, 1, f2), dtype=jnp.float32)

    out2 = jax.block_until_ready(case_activation_layer(x2, w2, b2))
    ref2 = _reference(x2, w2, b2)
    assert out2.shape == (m2, c2)
    assert jnp.allclose(out2, ref2, atol=5e-3, rtol=5e-3)

    print("KERNEL_OK")
</pallas_src>

<mosaic_0001>
module attributes {stable_mosaic.version = 11 : i64} {
  func.func @_case_activation_kernel(%arg0: i32, %arg1: i32, %arg2: i32, %arg3: memref<8x32xf32, #tpu.memory_space<vmem>>, %arg4: memref<32x128xf32, #tpu.memory_space<vmem>>, %arg5: memref<1x128xf32, #tpu.memory_space<vmem>>, %arg6: memref<8x128xf32, #tpu.memory_space<vmem>>, %arg7: memref<8x128xf32, #tpu.memory_space<vmem>>) attributes {dimension_semantics = [#tpu.dimension_semantics<parallel>, #tpu.dimension_semantics<parallel>, #tpu.dimension_semantics<arbitrary>], iteration_bounds = array<i64: 1, 1, 1>, scalar_prefetch = 0 : i64, scratch_operands = 1 : i64, tpu.core_type = #tpu.core_type<tc>, window_params = [{transform_indices = @transform_0, window_bounds = array<i64: 8, 32>}, {transform_indices = @transform_1, window_bounds = array<i64: 32, 128>}, {transform_indices = @transform_2, window_bounds = array<i64: 1, 128>}, {transform_indices = @transform_3, window_bounds = array<i64: 8, 128>}]} {
    %c0_i32 = arith.constant 0 : i32
    %0 = arith.cmpi eq, %arg2, %c0_i32 : i32
    %1 = arith.extui %0 : i1 to i32
    %c0_i32_0 = arith.constant 0 : i32
    %2 = arith.cmpi ne, %1, %c0_i32_0 : i32
    scf.if %2 {
      %cst_12 = arith.constant 0.000000e+00 : f32
      %17 = vector.broadcast %cst_12 : f32 to vector<8x128xf32>
      %c0_13 = arith.constant 0 : index
      %c0_14 = arith.constant 0 : index
      %18 = vector.load %arg7[%c0_13, %c0_14] : memref<8x128xf32, #tpu.memory_space<vmem>>, vector<8x128xf32>
      tpu.vector_store %arg7[%c0_13, %c0_14], %17 {strides = array<i32>} : memref<8x128xf32, #tpu.memory_space<vmem>>, vector<8x128xf32>,
    } else {
    }
    %c0 = arith.constant 0 : index
    %c0_1 = arith.constant 0 : index
    %3 = vector.load %arg4[%c0, %c0_1] : memref<32x128xf32, #tpu.memory_space<vmem>>, vector<32x128xf32>
    %cst = arith.constant 0.000000e+00 : f32
    %4 = vector.broadcast %cst : f32 to vector<32x128xf32>
    %5 = arith.cmpf oge, %3, %4 : vector<32x128xf32>
    %cst_2 = arith.constant 0.00999999977 : f32
    %6 = vector.broadcast %cst_2 : f32 to vector<32x128xf32>
    %7 = arith.mulf %6, %3 : vector<32x128xf32>
    %8 = arith.select %5, %3, %7 : vector<32x128xi1>, vector<32x128xf32>
    %c0_3 = arith.constant 0 : index
    %c0_4 = arith.constant 0 : index
    %9 = vector.load %arg7[%c0_3, %c0_4] : memref<8x128xf32, #tpu.memory_space<vmem>>, vector<8x128xf32>
    %c0_5 = arith.constant 0 : index
    %c0_6 = arith.constant 0 : index
    %10 = vector.load %arg3[%c0_5, %c0_6] : memref<8x32xf32, #tpu.memory_space<vmem>>, vector<8x32xf32>
    %cst_7 = arith.constant dense<0.000000e+00> : vector<8x128xf32>
    %11 = tpu.matmul %10, %8, %cst_7 {dimension_numbers = #tpu.dot_dimension_numbers<[1], [0], [0], [1], [0, 0, 1, 1], [], []>} : vector<8x32xf32>, vector<32x128xf32>, vector<8x128xf32> -> vector<8x128xf32>
    %12 = arith.addf %9, %11 : vector<8x128xf32>
    %c0_8 = arith.constant 0 : index
    %c0_9 = arith.constant 0 : index
    %13 = vector.load %arg7[%c0_8, %c0_9] : memref<8x128xf32, #tpu.memory_space<vmem>>, vector<8x128xf32>
    tpu.vector_store %arg7[%c0_8, %c0_9], %12 {strides = array<i32>} : memref<8x128xf32, #tpu.memory_space<vmem>>, vector<8x128xf32>,
    %c0_i32_10 = arith.constant 0 : i32
    %14 = arith.cmpi eq, %arg2, %c0_i32_10 : i32
    %15 = arith.extui %14 : i1 to i32
    %c0_i32_11 = arith.constant 0 : i32
    %16 = arith.cmpi ne, %15, %c0_i32_11 : i32
    scf.if %16 {
      %c0_12 = arith.constant 0 : index
      %c0_13 = arith.constant 0 : index
      %17 = vector.load %arg7[%c0_12, %c0_13] : memref<8x128xf32, #tpu.memory_space<vmem>>, vector<8x128xf32>
      %c0_14 = arith.constant 0 : index
      %c0_15 = arith.constant 0 : index
      %18 = vector.load %arg5[%c0_14, %c0_15] : memref<1x128xf32, #tpu.memory_space<vmem>>, vector<1x128xf32>
      %19 = vector.broadcast %18 : vector<1x128xf32> to vector<8x128xf32>
      %20 = arith.subf %17, %19 : vector<8x128xf32>
      %cst_16 = arith.constant 3.000000e+01 : f32
      %21 = vector.broadcast %cst_16 : f32 to vector<8x128xf32>
      %22 = arith.minimumf %20, %21 : vector<8x128xf32>
      %23 = math.exp %22 : vector<8x128xf32>
      %cst_17 = arith.constant 1.000000e+00 : f32
      %24 = vector.broadcast %cst_17 : f32 to vector<8x128xf32>
      %25 = arith.addf %24, %23 : vector<8x128xf32>
      %26 = tpu.reciprocal %25 {approx = true} : vector<8x128xf32> -> vector<8x128xf32>
      %c0_18 = arith.constant 0 : index
      %c0_19 = arith.constant 0 : index
      %27 = vector.load %arg6[%c0_18, %c0_19] : memref<8x128xf32, #tpu.memory_space<vmem>>, vector<8x128xf32>
      tpu.vector_store %arg6[%c0_18, %c0_19], %26 {strides = array<i32>} : memref<8x128xf32, #tpu.memory_space<vmem>>, vector<8x128xf32>,
    } else {
    }
    return
  }
  func.func @transform_0(%arg0: i32, %arg1: i32, %arg2: i32) -> (i32, i32) {
    %c0_i32 = arith.constant 0 : i32
    return %arg0, %arg2 : i32, i32
  }
  func.func @transform_1(%arg0: i32, %arg1: i32, %arg2: i32) -> (i32, i32) {
    %c0_i32 = arith.constant 0 : i32
    return %arg2, %arg1 : i32, i32
  }
  func.func @transform_2(%arg0: i32, %arg1: i32, %arg2: i32) -> (i32, i32) {
    %c0_i32 = arith.constant 0 : i32
    %c0_i32_0 = arith.constant 0 : i32
    return %c0_i32, %arg1 : i32, i32
  }
  func.func @transform_3(%arg0: i32, %arg1: i32, %arg2: i32) -> (i32, i32) {
    %c0_i32 = arith.constant 0 : i32
    return %arg0, %arg1 : i32, i32
  }
}

</mosaic_0001>

<bundles_post_ra>
// kernel: tpu_custom_call.1
= control target key start
LH: loop header
LB: loop body
LE: loop exit
PB: predicated region body
PF: predicated region fallthrough
CT: control target
= control target key end

     0   :  { %8 = vsyncpa [#allocation4], 0  ;;  %s253_s0 = inlined_call_operand.hbm [shape: f32[8,32], index: 0, kind: input, shape index: {}]   ;;  %s254_s1 = inlined_call_operand.hbm [shape: f32[32,128], index: 1, kind: input, shape index: {}]   ;;  %s255_s2 = inlined_call_operand.vmem [shape: f32[1,128], index: 2, kind: input, shape index: {}]   ;;  %s256_s3 = inlined_call_operand.hbm [shape: f32[8,128], index: 3, kind: output, shape index: {}]  }
   0x1   :  { %9 = vsyncpa [#allocation7], 0 }
   0x2   :  { %10 = vsyncpa [#allocation5], 0  ;;  %s16_s14 = sshll.u32 %s253_s0, 4  ;;  %s216_s15 = smov [#allocation3]   ;;  %s17_s14 = int_to_ptr.hbm [resolvable:$true] %s16_s14 }
   0x3   :  { %s18_s16 = sshll.u32 %s216_s15, 4  ;;  %s26_s19 = sshll.u32 %s254_s1, 4  ;;  %s19_s16 = int_to_ptr.vmem [resolvable:$true] %s18_s16  ;;  %s27_s19 = int_to_ptr.hbm [resolvable:$true] %s26_s19 }
   0x4   :  { %21 = dma.hbm_to_vmem [thread:$0]  %s17_s14, 128, %s19_s16, [#allocation4]  }
   0x5   :  { %s217_s20 = smov [#allocation6]   ;;  %s218_s22 = smov 128  }
   0x6   :  { %s28_s21 = sshll.u32 %s217_s20, 4  ;;  %s219_s23 = smov 8   ;;  %s29_s21 = int_to_ptr.vmem [resolvable:$true] %s28_s21 }
   0x7   :  { %34 = dma.hbm_to_vmem [thread:$0]  %s27_s19, 512, %s29_s21, [#allocation7], %s218_s22, %s218_s22, %s219_s23  }
   0x8   :  { %210 = dma.done.wait [#allocation4], 128  }
   0x9   :  { %211 = vsyncadd [#allocation4], 4294967168 }
   0xa   :  { %212 = dma.done.wait [#allocation7], 512  }
   0xb   :  { %213 = vsyncadd [#allocation7], 4294966784  ;;  %v53_v0 = vld [vmem:[#allocation6 + $0x18] sm:$0xff]  ;;  %v52_v1 = vld [vmem:[#allocation6 + $0x10] sm:$0xff]  ;;  %vm68_vm4 = vcmask 261120   ;;  %s220_s24 = smov [#allocation8]  }
   0xc   :  { %v51_v2 = vld [vmem:[#allocation6 + $0x8] sm:$0xff]  ;;  %vm57_vm0 = vcmp.ge.f32.partialorder %v53_v0, 0.0  ;;  %v61_v3 = vmul.f32 0.01, %v53_v0  ;;  %vm56_vm1 = vcmp.ge.f32.partialorder %v52_v1, 0.0  ;;  %v50_v6 = vld [vmem:[#allocation6] sm:$0xff] }
   0xd   :  { %v60_v4 = vmul.f32 0.01, %v52_v1  ;;  %vm55_vm2 = vcmp.ge.f32.partialorder %v51_v2, 0.0  ;;  %v59_v5 = vmul.f32 0.01, %v51_v2  ;;  %vm54_vm3 = vcmp.ge.f32.partialorder %v50_v6, 0.0 }
   0xe   :  { %v65_v7 = vsel %vm57_vm0, %v53_v0, %v61_v3  ;;  %v58_v9 = vmul.f32 0.01, %v50_v6  ;;  %v67_v12 = vld [vmem:[#allocation3] sm:$0xff]  ;;  %s114_s25 = sshll.u32 %s220_s24, 4  ;;  %s116_s28 = sshll.u32 %s256_s3, 4  ;;  %s115_s25 = int_to_ptr.vmem [resolvable:$true] %s114_s25  ;;  %s117_s28 = int_to_ptr.hbm [resolvable:$true] %s116_s28 }
   0xf   :  { %v64_v8 = vsel %vm56_vm1, %v52_v1, %v60_v4  ;;  %84 = vmatpush.msra.mxu0 %v65_v7  ;;  %v63_v10 = vsel %vm55_vm2, %v51_v2, %v59_v5  ;;  %v133_v13 = vld [vmem:[%s255_s2] ss:$0 sm:$0xff] }
  0x10   :  { %v62_v11 = vsel %vm54_vm3, %v50_v6, %v58_v9 }
  0x11   :  { %85 = vmatpush.msra.mxu0 %v64_v8 }
  0x13   :  { %86 = vmatpush.msra.mxu0 %v63_v10 }
  0x15   :  { %87 = vmatpush.msra.mxu0 %v62_v11 }
  0x16   :  { %127 = vmatmul.msk.f32.vlgmr.msra.gmra.mxu0 %vm68_vm4, %v67_v12 }
  0x93   :  { %v89_v14 = vpop.f32.mrf.mxu0 }
  0x94   :  { %v102_v15 = vsub.f32 %v89_v14, %v133_v13 }
  0x96   :  { %v103_v16 = vmin.f32 %v102_v15, 30.0 }
  0x98   :  { %v104_v17 = vmul.f32 1.442695, %v103_v16 }
  0x9a   :  { %134 = vpow2.f32 %v104_v17 }
  0xa0   :  { %v135_v18 = vpop.eup %134 }
  0xa1   :  { %v106_v19 = vadd.f32 1.0, %v135_v18 }
  0xa3   :  { %136 = vrcp.f32 %v106_v19 }
  0xa9   :  { %v137_v20 = vpop.eup %136 }
  0xaa   :  { %108 = vst [vmem:[#allocation8] sm:$0xff] %v137_v20 }
  0xab   :  { %119 = dma.vmem_to_hbm [thread:$0]  %s115_s25, 128, %s117_s28, [#allocation5]  }
  0xac   :  { %214 = dma.done.wait [#allocation5], 128  }
  0xad   :  { %215 = vsyncadd [#allocation5], 4294967168 }
  0xae   :  { %124 = vsyncpa [#allocation4], 1 }
  0xaf   :  { %125 = vsyncpa [#allocation7], 1 }
  0xb0   :  { %126 = vsyncpa [#allocation5], 1 }

</bundles_post_ra>
